<compile_context>
chip_gen: v7x
topology: tpu7x:2x2x1
jax: 0.10.0
libtpu: 0.0.40
codegen_flags: <defaults>
</compile_context>

<pallas_src>
from functools import partial

import jax
import jax.numpy as jnp
from jax import lax
from jax.experimental import pallas as pl
from jax.experimental.pallas import tpu as pltpu

LANE = 128
SUBLANE = 8
MAX_TILE_ROWS = 2048   # (2048, 128) f32 block = 1 MiB per input
NUM_SHARDS = 2         # reduction sharded across 2 TCs on v7x; no-op cost on 1-TC chips


def _focal_factor(one_minus_pt, gamma):
    """(1 - pt) ** gamma, specialized at trace time on the (static) gamma value."""
    g = float(gamma)
    if g == 0.0:
        # torch semantics: x ** 0 == 1 (including 0 ** 0)
        return jnp.ones_like(one_minus_pt)
    if g == round(g) and 1 <= int(round(g)) <= 8:
        gi = int(round(g))
        f = one_minus_pt
        for _ in range(gi - 1):
            f = f * one_minus_pt          # pure VPU, no transcendentals
        return f
    # general float gamma; 0 ** gamma -> 0 for gamma > 0 (matches torch)
    safe = jnp.maximum(one_minus_pt, jnp.float32(1e-38))
    return jnp.where(one_minus_pt > 0.0,
                     jnp.exp(jnp.float32(g) * jnp.log(safe)),
                     jnp.float32(0.0))


def _focal_bce_kernel(*refs, gamma, n_valid, tile_rows, steps_per_shard, has_weights):
    if has_weights:
        l_ref, t_ref, w_ref, out_ref = refs
    else:
        l_ref, t_ref, out_ref = refs
        w_ref = None

    c = pl.program_id(0)   # shard (parallel axis)
    i = pl.program_id(1)   # step within shard (reduction axis)

    @pl.when(i == 0)
    def _init():
        out_ref[...] = jnp.zeros_like(out_ref)

    x = l_ref[...].astype(jnp.float32)
    t = t_ref[...].astype(jnp.float32)

    # numerically-stable binary_cross_entropy_with_logits, reduction='none'
    bce = jnp.maximum(x, 0.0) - x * t + jnp.log1p(jnp.exp(-jnp.abs(x)))
    pt = jnp.exp(-bce)
    focal = _focal_factor(1.0 - pt, gamma) * bce
    if w_ref is not None:
        focal = focal * w_ref[...].astype(jnp.float32)

    # Mask tail / padded / out-of-range elements of this block against the original n.
    blk = c * steps_per_shard + i
    base = blk * (tile_rows * LANE)
    row_ids = lax.broadcasted_iota(jnp.int32, (tile_rows, LANE), 0)
    lane_ids = lax.broadcasted_iota(jnp.int32, (tile_rows, LANE), 1)
    gidx = base + row_ids * LANE + lane_ids
    focal = jnp.where(gidx < n_valid, focal, jnp.float32(0.0))

    # Fold this block into the resident (1,128) partial-sum accumulator for this shard.
    psum = jnp.sum(focal, axis=0, keepdims=True)          # (1, LANE)
    out_ref[...] = out_ref[...] + psum[None, :, :]         # out block is (1, 1, LANE)


def weighted_bce_with_logits_loss(logits, targets, weights=None, gamma=2.0,
                                  max_tile_rows=MAX_TILE_ROWS):
    """Pallas equivalent of WeightedBCEWithLogitsLoss(gamma, reduction='mean').forward."""
    n = logits.size
    flat = [logits.reshape(-1),
            jnp.broadcast_to(targets, logits.shape).reshape(-1)]
    if weights is not None:
        flat.append(jnp.broadcast_to(weights, logits.shape).reshape(-1))

    # Pad (only when needed) to a multiple of 8*128 so the flat array reshapes to a
    # lane-dense (rows, 128) slab with rows % 8 == 0.  Padded elements are masked
    # inside the kernel (compared against the original n), so pad values don't matter.
    unit = SUBLANE * LANE
    padded = pl.cdiv(n, unit) * unit
    if padded != n:
        flat = [jnp.pad(a, (0, padded - n)) for a in flat]
    rows = padded // LANE
    ins = [a.reshape(rows, LANE) for a in flat]

    tile_rows = min(int(max_tile_rows), rows)      # both multiples of 8
    num_blocks = pl.cdiv(rows, tile_rows)
    n_shards = min(NUM_SHARDS, num_blocks)
    steps = pl.cdiv(num_blocks, n_shards)

    in_spec = pl.BlockSpec((tile_rows, LANE), lambda c, i: (c * steps + i, 0))
    kernel = partial(_focal_bce_kernel,
                     gamma=float(gamma), n_valid=int(n),
                     tile_rows=tile_rows, steps_per_shard=int(steps),
                     has_weights=weights is not None)

    partials = pl.pallas_call(
        kernel,
        out_shape=jax.ShapeDtypeStruct((n_shards, 1, LANE), jnp.float32),
        grid_spec=pltpu.PrefetchScalarGridSpec(
            num_scalar_prefetch=0,
            grid=(n_shards, steps),
            in_specs=[in_spec] * len(ins),
            out_specs=pl.BlockSpec((1, 1, LANE), lambda c, i: (c, 0, 0)),
        ),
        compiler_params=pltpu.CompilerParams(
            dimension_semantics=("parallel", "arbitrary")),
    )(*ins)

    # Tiny final reduce + mean scaling in XLA (a few hundred floats at most).
    return jnp.sum(partials) * jnp.float32(1.0 / n)


def _reference(logits, targets, weights=None, gamma=2.0):
    x = logits.astype(jnp.float32)
    t = targets.astype(jnp.float32)
    bce = jnp.maximum(x, 0.0) - x * t + jnp.log1p(jnp.exp(-jnp.abs(x)))
    pt = jnp.exp(-bce)
    focal = (1.0 - pt) ** gamma * bce
    if weights is not None:
        focal = focal * weights.astype(jnp.float32)
    return jnp.mean(focal)


if __name__ == "__main__":
    key = jax.random.PRNGKey(0)
    k1, k2, k3, k4, k5, k6 = jax.random.split(key, 6)

    # NCHW-like segmentation logits: batch=2, channels=4, spatial=16x16
    logits = jax.random.normal(k1, (2, 4, 16, 16), dtype=jnp.float32) * 2.0
    targets = (jax.random.uniform(k2, (2, 4, 16, 16)) > 0.5).astype(jnp.float32)
    weights = jax.random.uniform(k3, (2, 4, 16, 16), dtype=jnp.float32) + 0.5

    # with explicit weights (gamma=2 -> VPU-multiply fast path)
    loss_w = weighted_bce_with_logits_loss(logits, targets, weights, gamma=2.0)
    jax.block_until_ready(loss_w)
    ref_w = _reference(logits, targets, weights, gamma=2.0)
    assert jnp.allclose(loss_w, ref_w, rtol=2e-5, atol=1e-6), (loss_w, ref_w)

    # weights=None path (2-input kernel variant)
    loss = weighted_bce_with_logits_loss(logits, targets, None, gamma=2.0)
    jax.block_until_ready(loss)
    ref = _reference(logits, targets, None, gamma=2.0)
    assert jnp.allclose(loss, ref, rtol=2e-5, atol=1e-6), (loss, ref)

    # odd-sized input: exercises padding-to-1024, in-kernel tail masking,
    # multi-block grid, the 2-shard parallel axis, and the non-integer-gamma path.
    logits_o = jax.random.normal(k4, (3, 5, 17, 19), dtype=jnp.float32) * 2.0
    targets_o = (jax.random.uniform(k5, (3, 5, 17, 19)) > 0.5).astype(jnp.float32)
    weights_o = jax.random.uniform(k6, (3, 5, 17, 19), dtype=jnp.float32) + 0.5
    loss_o = weighted_bce_with_logits_loss(logits_o, targets_o, weights_o,
                                           gamma=1.5, max_tile_rows=8)
    jax.block_until_ready(loss_o)
    ref_o = _reference(logits_o, targets_o, weights_o, gamma=1.5)
    assert jnp.allclose(loss_o, ref_o, rtol=2e-5, atol=1e-6), (loss_o, ref_o)

    # bf16 inputs: cast happens in VMEM inside the kernel, no wrapper astype passes
    logits_b = logits.astype(jnp.bfloat16)
    targets_b = targets.astype(jnp.bfloat16)
    loss_b = weighted_bce_with_logits_loss(logits_b, targets_b, None, gamma=2.0)
    jax.block_until_ready(loss_b)
    ref_b = _reference(logits_b, targets_b, None, gamma=2.0)
    assert jnp.allclose(loss_b, ref_b, rtol=2e-5, atol=1e-6), (loss_b, ref_b)

    print("KERNEL_OK")
</pallas_src>

<mosaic_0001>
module attributes {stable_mosaic.version = 11 : i64} {
  func.func @_focal_bce_kernel(%arg0: i32, %arg1: i32, %arg2: memref<16x128xf32, #tpu.memory_space<vmem>>, %arg3: memref<16x128xf32, #tpu.memory_space<vmem>>, %arg4: memref<16x128xf32, #tpu.memory_space<vmem>>, %arg5: memref<1x1x128xf32, #tpu.memory_space<vmem>>) attributes {dimension_semantics = [#tpu.dimension_semantics<parallel>, #tpu.dimension_semantics<arbitrary>], iteration_bounds = array<i64: 1, 1>, scalar_prefetch = 0 : i64, scratch_operands = 0 : i64, tpu.core_type = #tpu.core_type<tc>, window_params = [{transform_indices = @transform_0, window_bounds = array<i64: 16, 128>}, {transform_indices = @transform_1, window_bounds = array<i64: 16, 128>}, {transform_indices = @transform_2, window_bounds = array<i64: 16, 128>}, {transform_indices = @transform_3, window_bounds = array<i64: 1, 1, 128>}]} {
    %c0_i32 = arith.constant 0 : i32
    %0 = arith.cmpi eq, %arg1, %c0_i32 : i32
    %1 = arith.extui %0 : i1 to i32
    %c0_i32_0 = arith.constant 0 : i32
    %2 = arith.cmpi ne, %1, %c0_i32_0 : i32
    scf.if %2 {
      %cst_18 = arith.constant 0.000000e+00 : f32
      %44 = vector.broadcast %cst_18 : f32 to vector<1x1x128xf32>
      %c0_19 = arith.constant 0 : index
      %c0_20 = arith.constant 0 : index
      %c0_21 = arith.constant 0 : index
      %45 = vector.load %arg5[%c0_19, %c0_20, %c0_21] : memref<1x1x128xf32, #tpu.memory_space<vmem>>, vector<1x1x128xf32>
      tpu.vector_store %arg5[%c0_19, %c0_20, %c0_21], %44 {strides = array<i32>} : memref<1x1x128xf32, #tpu.memory_space<vmem>>, vector<1x1x128xf32>,
    } else {
    }
    %c0 = arith.constant 0 : index
    %c0_1 = arith.constant 0 : index
    %3 = vector.load %arg2[%c0, %c0_1] : memref<16x128xf32, #tpu.memory_space<vmem>>, vector<16x128xf32>
    %c0_2 = arith.constant 0 : index
    %c0_3 = arith.constant 0 : index
    %4 = vector.load %arg3[%c0_2, %c0_3] : memref<16x128xf32, #tpu.memory_space<vmem>>, vector<16x128xf32>
    %cst = arith.constant 0.000000e+00 : f32
    %5 = vector.broadcast %cst : f32 to vector<16x128xf32>
    %6 = arith.maximumf %3, %5 : vector<16x128xf32>
    %7 = arith.mulf %3, %4 : vector<16x128xf32>
    %8 = arith.subf %6, %7 : vector<16x128xf32>
    %9 = math.absf %3 : vector<16x128xf32>
    %cst_4 = arith.constant 0.000000e+00 : f32
    %10 = vector.broadcast %cst_4 : f32 to vector<16x128xf32>
    %11 = arith.subf %10, %9 : vector<16x128xf32>
    %12 = math.exp %11 : vector<16x128xf32>
    %13 = math.log1p %12 : vector<16x128xf32>
    %14 = arith.addf %8, %13 : vector<16x128xf32>
    %cst_5 = arith.constant 0.000000e+00 : f32
    %15 = vector.broadcast %cst_5 : f32 to vector<16x128xf32>
    %16 = arith.subf %15, %14 : vector<16x128xf32>
    %17 = math.exp %16 : vector<16x128xf32>
    %cst_6 = arith.constant 1.000000e+00 : f32
    %18 = vector.broadcast %cst_6 : f32 to vector<16x128xf32>
    %19 = arith.subf %18, %17 : vector<16x128xf32>
    %20 = arith.mulf %19, %19 : vector<16x128xf32>
    %21 = arith.mulf %20, %14 : vector<16x128xf32>
    %c0_7 = arith.constant 0 : index
    %c0_8 = arith.constant 0 : index
    %22 = vector.load %arg4[%c0_7, %c0_8] : memref<16x128xf32, #tpu.memory_space<vmem>>, vector<16x128xf32>
    %23 = arith.mulf %21, %22 : vector<16x128xf32>
    %c1_i32 = arith.constant 1 : i32
    %24 = arith.muli %arg0, %c1_i32 : i32
    %25 = arith.addi %24, %arg1 : i32
    %c2048_i32 = arith.constant 2048 : i32
    %26 = arith.muli %25, %c2048_i32 : i32
    %27 = tpu.iota {dimensions = array<i32: 0>} : vector<16x128xi32>
    %28 = tpu.iota {dimensions = array<i32: 1>} : vector<16x128xi32>
    %c128_i32 = arith.constant 128 : i32
    %29 = vector.broadcast %c128_i32 : i32 to vector<16x128xi32>
    %30 = arith.muli %27, %29 : vector<16x128xi32>
    %31 = vector.broadcast %26 : i32 to vector<16x128xi32>
    %32 = arith.addi %31, %30 : vector<16x128xi32>
    %33 = arith.addi %32, %28 : vector<16x128xi32>
    %c2048_i32_9 = arith.constant 2048 : i32
    %34 = vector.broadcast %c2048_i32_9 : i32 to vector<16x128xi32>
    %35 = arith.cmpi slt, %33, %34 : vector<16x128xi32>
    %cst_10 = arith.constant 0.000000e+00 : f32
    %36 = vector.broadcast %cst_10 : f32 to vector<16x128xf32>
    %37 = arith.select %35, %23, %36 : vector<16x128xi1>, vector<16x128xf32>
    %cst_11 = arith.constant dense<0.000000e+00> : vector<128xf32>
    %38 = vector.multi_reduction <add>, %37, %cst_11 [0] : vector<16x128xf32> to vector<128xf32>
    %39 = vector.shape_cast %38 : vector<128xf32> to vector<1x128xf32>
    %c0_12 = arith.constant 0 : index
    %c0_13 = arith.constant 0 : index
    %c0_14 = arith.constant 0 : index
    %40 = vector.load %arg5[%c0_12, %c0_13, %c0_14] : memref<1x1x128xf32, #tpu.memory_space<vmem>>, vector<1x1x128xf32>
    %41 = vector.shape_cast %39 : vector<1x128xf32> to vector<1x1x128xf32>
    %42 = arith.addf %40, %41 : vector<1x1x128xf32>
    %c0_15 = arith.constant 0 : index
    %c0_16 = arith.constant 0 : index
    %c0_17 = arith.constant 0 : index
    %43 = vector.load %arg5[%c0_15, %c0_16, %c0_17] : memref<1x1x128xf32, #tpu.memory_space<vmem>>, vector<1x1x128xf32>
    tpu.vector_store %arg5[%c0_15, %c0_16, %c0_17], %42 {strides = array<i32>} : memref<1x1x128xf32, #tpu.memory_space<vmem>>, vector<1x1x128xf32>,
    return
  }
  func.func @transform_0(%arg0: i32, %arg1: i32) -> (i32, i32) {
    %c1_i32 = arith.constant 1 : i32
    %0 = arith.muli %arg0, %c1_i32 : i32
    %1 = arith.addi %0, %arg1 : i32
    %c0_i32 = arith.constant 0 : i32
    %c0_i32_0 = arith.constant 0 : i32
    return %1, %c0_i32 : i32, i32
  }
  func.func @transform_1(%arg0: i32, %arg1: i32) -> (i32, i32) {
    %c1_i32 = arith.constant 1 : i32
    %0 = arith.muli %arg0, %c1_i32 : i32
    %1 = arith.addi %0, %arg1 : i32
    %c0_i32 = arith.constant 0 : i32
    %c0_i32_0 = arith.constant 0 : i32
    return %1, %c0_i32 : i32, i32
  }
  func.func @transform_2(%arg0: i32, %arg1: i32) -> (i32, i32) {
    %c1_i32 = arith.constant 1 : i32
    %0 = arith.muli %arg0, %c1_i32 : i32
    %1 = arith.addi %0, %arg1 : i32
    %c0_i32 = arith.constant 0 : i32
    %c0_i32_0 = arith.constant 0 : i32
    return %1, %c0_i32 : i32, i32
  }
  func.func @transform_3(%arg0: i32, %arg1: i32) -> (i32, i32, i32) {
    %c0_i32 = arith.constant 0 : i32
    %c0_i32_0 = arith.constant 0 : i32
    %c0_i32_1 = arith.constant 0 : i32
    return %arg0, %c0_i32, %c0_i32_0 : i32, i32, i32
  }
}

</mosaic_0001>

<bundles_post_ra>
// kernel: tpu_custom_call.1
= control target key start
LH: loop header
LB: loop body
LE: loop exit
PB: predicated region body
PF: predicated region fallthrough
CT: control target
= control target key end

     0   :  { %8 = vsyncpa [#allocation3], 0  ;;  %s381_s0 = inlined_call_operand.hbm [shape: f32[16,128], index: 0, kind: input, shape index: {}]   ;;  %s382_s1 = inlined_call_operand.hbm [shape: f32[16,128], index: 1, kind: input, shape index: {}]   ;;  %s383_s2 = inlined_call_operand.hbm [shape: f32[16,128], index: 2, kind: input, shape index: {}]   ;;  %s384_s3 = inlined_call_operand.hbm [shape: f32[1,1,128], index: 3, kind: output, shape index: {}]  }
   0x1   :  { %9 = vsyncpa [#allocation6], 0 }
   0x2   :  { %10 = vsyncpa [#allocation4], 0  ;;  %s290_s12 = smov [#allocation5]   ;;  %s291_s14 = smov [#allocation2]  }
   0x3   :  { %s36_s13 = sshll.u32 %s290_s12, 4  ;;  %s20_s15 = sshll.u32 %s291_s14, 4  ;;  %s37_s13 = int_to_ptr.vmem [resolvable:$true] %s36_s13  ;;  %s317_s15 = int_to_ptr.vmem [resolvable:$true] %s20_s15 }
   0x4   :  { %s196_s18 = scalar_lea.hbm %s382_s1, 256 }
   0x5   :  { %p197_p0 = scmp.ne.s32.totalorder %s382_s1, %s196_s18  ;;  %p200_p1 = scmp.lt.u32.totalorder %s196_s18, %s382_s1 }
   0x7   :  { %p202_p2 = pnand %p200_p1, %p197_p0 }
   0x9   :  { %205 = shalt.err (!%p202_p2)
}
   0xa   :  { %s206_s23 = scalar_lea.vmem %s37_s13, 256  ;;  %p211_p4 = scmp.lt.s32.totalorder %s37_s13, %s37_s13 }
   0xb   :  { %p207_p3 = scmp.ne.s32.totalorder %s37_s13, %s206_s23  ;;  %p212_p5 = scmp.lt.s32.totalorder %s206_s23, %s206_s23 }
   0xd   :  { %p213_p6 = por %p212_p5, %p211_p4 }
   0xf   :  { %p214_p7 = pnand %p213_p6, %p207_p3 }
  0x11   :  { %217 = shalt.err (!%p214_p7)
}
  0x12   :  { %s292_s24 = smov 128   ;;  %s293_s25 = smov 8  }
  0x13   :  { %42 = dma.hbm_to_vmem [thread:$0]  %s382_s1, 256, %s37_s13, [#allocation6], %s292_s24, %s292_s24, %s293_s25  }
  0x14   :  { %s218_s30 = scalar_lea.hbm %s381_s0, 256 }
  0x15   :  { %p219_p8 = scmp.ne.s32.totalorder %s381_s0, %s218_s30  ;;  %p222_p9 = scmp.lt.u32.totalorder %s218_s30, %s381_s0 }
  0x17   :  { %p224_p10 = pnand %p222_p9, %p219_p8 }
  0x19   :  { %227 = shalt.err (!%p224_p10)
}
  0x1a   :  { %s228_s8 = scalar_lea.vmem %s317_s15, 256  ;;  %p233_p12 = scmp.lt.s32.totalorder %s317_s15, %s317_s15 }
  0x1b   :  { %p229_p11 = scmp.ne.s32.totalorder %s317_s15, %s228_s8  ;;  %p234_p13 = scmp.lt.s32.totalorder %s228_s8, %s228_s8 }
  0x1d   :  { %p235_p0 = por %p234_p13, %p233_p12 }
  0x1f   :  { %p236_p1 = pnand %p235_p0, %p229_p11 }
  0x21   :  { %239 = shalt.err (!%p236_p1)
}
  0x22   :  { %26 = dma.hbm_to_vmem [thread:$0]  %s381_s0, 256, %s317_s15, [#allocation3], %s292_s24, %s292_s24, %s293_s25  }
  0x23   :  { %s294_s10 = smov [#allocation7]   ;;  %s240_s14 = scalar_lea.hbm %s383_s2, 256 }
  0x24   :  { %s52_s11 = sshll.u32 %s294_s10, 4  ;;  %p241_p2 = scmp.ne.s32.totalorder %s383_s2, %s240_s14  ;;  %s53_s11 = int_to_ptr.vmem [resolvable:$true] %s52_s11 }
  0x25   :  { %p244_p3 = scmp.lt.u32.totalorder %s240_s14, %s383_s2 }
  0x27   :  { %p246_p4 = pnand %p244_p3, %p241_p2 }
  0x29   :  { %249 = shalt.err (!%p246_p4)
}
  0x2a   :  { %s250_s20 = scalar_lea.vmem %s53_s11, 256  ;;  %p255_p6 = scmp.lt.s32.totalorder %s53_s11, %s53_s11 }
  0x2b   :  { %p251_p5 = scmp.ne.s32.totalorder %s53_s11, %s250_s20  ;;  %p256_p7 = scmp.lt.s32.totalorder %s250_s20, %s250_s20 }
  0x2d   :  { %p257_p8 = por %p256_p7, %p255_p6 }
  0x2f   :  { %p258_p9 = pnand %p257_p8, %p251_p5 }
  0x31   :  { %261 = shalt.err (!%p258_p9)
}
  0x32   :  { %58 = dma.hbm_to_vmem [thread:$0]  %s383_s2, 256, %s53_s11, [#allocation6], %s292_s24, %s292_s24, %s293_s25  }
  0x33   :  { %284 = dma.done.wait [#allocation3], 256  }
  0x34   :  { %285 = vsyncadd [#allocation3], 4294967040 }
  0x35   :  { %286 = dma.done.wait [#allocation6], 512  }
  0x36   :  { %287 = vsyncadd [#allocation6], 4294966784  ;;  %v295_v0 = vmov 0.0   ;;  %v79_v1 = vld [vmem:[#allocation2] sm:$0xff]  ;;  %v80_v2 = vld [vmem:[#allocation2 + $0x8] sm:$0xff]  ;;  %v135_v39 = vlaneseq  ;;  %s296_s2 = smov [#allocation8]  }
  0x37   :  { %78 = vst [vmem:[#allocation8] sm:$0x1] %v295_v0  ;;  %v89_v3 = vand.u32 2147483647, %v79_v1  ;;  %v90_v4 = vand.u32 2147483647, %v80_v2 }
  0x38   :  { %v81_v15 = vld [vmem:[#allocation5] sm:$0xff]  ;;  %v82_v16 = vld [vmem:[#allocation5 + $0x8] sm:$0xff]  ;;  %v83_v18 = vmax.f32 %v79_v1, 0.0  ;;  %v84_v22 = vmax.f32 %v80_v2, 0.0  ;;  %v136_v42 = vshrl.u32 %v135_v39, 7  ;;  %v139_v44 = vand.u32 127, %v135_v39 }
  0x39   :  { %v91_v5 = vsub.f32 0.0, %v89_v3  ;;  %v92_v6 = vsub.f32 0.0, %v90_v4  ;;  %v85_v19 = vmul.f32 %v81_v15, %v79_v1  ;;  %v86_v23 = vmul.f32 %v82_v16, %v80_v2  ;;  %v129_v55 = vld [vmem:[#allocation7] sm:$0xff]  ;;  %v130_v57 = vld [vmem:[#allocation7 + $0x8] sm:$0xff]  ;;  %s167_s21 = sshll.u32 %s296_s2, 4  ;;  %s168_s21 = int_to_ptr.vmem [resolvable:$true] %s167_s21 }
  0x3a   :  { %v137_v43 = vadd.s32 8, %v136_v42  ;;  %v140_v45 = vmul.u32 128, %v136_v42  ;;  %s262_s22 = scalar_lea.vmem %s168_s21, 16  ;;  %s266_s23 = scalar_lea.vmem %s168_s21, 32 }
  0x3b   :  { %v93_v7 = vmul.f32 1.442695, %v91_v5  ;;  %v95_v8 = vmul.f32 1.442695, %v92_v6  ;;  %v87_v27 = vsub.f32 %v83_v18, %v85_v19  ;;  %v88_v30 = vsub.f32 %v84_v22, %v86_v23  ;;  %p263_p10 = scmp.ne.s32.totalorder %s168_s21, %s262_s22  ;;  %p267_p11 = scmp.lt.s32.totalorder %s168_s21, %s168_s21 }
  0x3c   :  { %v141_v46 = vmul.u32 128, %v137_v43  ;;  %v145_v51 = vadd.s32 %v140_v45, %v139_v44  ;;  %p268_p12 = scmp.lt.s32.totalorder %s266_s23, %s262_s22 }
  0x3d   :  { %184 = vpow2.f32 %v93_v7 }
  0x3e   :  { %186 = vpow2.f32 %v95_v8  ;;  %v146_v53 = vadd.s32 %v141_v46, %v139_v44  ;;  %vm147_vm2 = vcmp.lt.s32.totalorder %v145_v51, 2048  ;;  %v158_v5 = vld [vmem:[#allocation8] sm:$0x1]  ;;  %p269_p13 = por %p268_p12, %p267_p11 }
  0x40   :  { %vm148_vm3 = vcmp.lt.s32.totalorder %v146_v53, 2048  ;;  %p270_p0 = pnand %p269_p13, %p263_p10 }
  0x47   :  { %v185_v9 = vpop.eup %184 }
  0x48   :  { %v187_v10 = vpop.eup %186  ;;  %v97_v11 = vadd.f32 1.0, %v185_v9  ;;  %v100_v13 = vmul.f32 -0.5, %v185_v9  ;;  %v103_v20 = vand.u32 2147483647, %v185_v9 }
  0x49   :  { %v106_v12 = vadd.f32 1.0, %v187_v10  ;;  %v109_v14 = vmul.f32 -0.5, %v187_v10  ;;  %v112_v24 = vand.u32 2147483647, %v187_v10 }
  0x4a   :  { %188 = vlog2.f32 %v97_v11  ;;  %v101_v17 = vadd.f32 1.0, %v100_v13  ;;  %vm104_vm0 = vcmp.lt.f32.partialorder %v103_v20, 0.0004427343 }
  0x4b   :  { %190 = vlog2.f32 %v106_v12  ;;  %v110_v21 = vadd.f32 1.0, %v109_v14  ;;  %vm113_vm1 = vcmp.lt.f32.partialorder %v112_v24, 0.0004427343 }
  0x4c   :  { %v102_v25 = vmul.f32 %v185_v9, %v101_v17 }
  0x4d   :  { %v111_v28 = vmul.f32 %v187_v10, %v110_v21 }
  0x54   :  { %v189_v26 = vpop.eup %188 }
  0x55   :  { %v191_v29 = vpop.eup %190  ;;  %v99_v31 = vmul.f32 0.6931472, %v189_v26 }
  0x56   :  { %v108_v32 = vmul.f32 0.6931472, %v191_v29 }
  0x57   :  { %v105_v33 = vsel %vm104_vm0, %v102_v25, %v99_v31 }
  0x58   :  { %v114_v34 = vsel %vm113_vm1, %v111_v28, %v108_v32  ;;  %v115_v35 = vadd.f32 %v105_v33, %v87_v27 }
  0x59   :  { %v116_v36 = vadd.f32 %v114_v34, %v88_v30 }
  0x5a   :  { %v117_v37 = vsub.f32 0.0, %v115_v35 }
  0x5b   :  { %v118_v38 = vsub.f32 0.0, %v116_v36 }
  0x5c   :  { %v119_v40 = vmul.f32 1.442695, %v117_v37 }
  0x5d   :  { %v121_v41 = vmul.f32 1.442695, %v118_v38 }
  0x5e   :  { %192 = vpow2.f32 %v119_v40 }
  0x5f   :  { %194 = vpow2.f32 %v121_v41 }
  0x68   :  { %v193_v47 = vpop.eup %192 }
  0x69   :  { %v195_v48 = vpop.eup %194  ;;  %v123_v49 = vsub.f32 1.0, %v193_v47 }
  0x6a   :  { %v124_v50 = vsub.f32 1.0, %v195_v48 }
  0x6b   :  { %v125_v52 = vmul.f32 %v123_v49, %v123_v49 }
  0x6c   :  { %v126_v54 = vmul.f32 %v124_v50, %v124_v50 }
  0x6d   :  { %v127_v56 = vmul.f32 %v125_v52, %v115_v35 }
  0x6e   :  { %v128_v58 = vmul.f32 %v126_v54, %v116_v36 }
  0x6f   :  { %v131_v59 = vmul.f32 %v129_v55, %v127_v56 }
  0x70   :  { %v132_v60 = vmul.f32 %v130_v57, %v128_v58 }
  0x71   :  { %v149_v61 = vsel %vm147_vm2, %v131_v59, 0.0 }
  0x72   :  { %v150_v62 = vsel %vm148_vm3, %v132_v60, 0.0 }
  0x73   :  { %v151_v63 = vadd.f32 %v150_v62, %v149_v61 }
  0x75   :  { %v152_v0 = vrot.slane %v151_v63, 4 }
  0x77   :  { %v153_v1 = vadd.f32 %v152_v0, %v151_v63 }
  0x79   :  { %v154_v2 = vrot.slane %v153_v1, 2 }
  0x7b   :  { %v155_v3 = vadd.f32 %v154_v2, %v153_v1 }
  0x7d   :  { %v156_v4 = vrot.slane %v155_v3, 1 }
  0x7f   :  { %v157_v6 = vadd.f32 %v156_v4, %v155_v3 }
  0x81   :  { %v159_v7 = vadd.f32 %v158_v5, %v157_v6 }
  0x83   :  { %160 = vst [vmem:[#allocation8] sm:$0x1] %v159_v7 }
  0x84   :  { %273 = shalt.err (!%p270_p0)
}
  0x85   :  { %s274_s26 = scalar_lea.hbm %s384_s3, 16 }
  0x86   :  { %p275_p1 = scmp.ne.s32.totalorder %s384_s3, %s274_s26  ;;  %p278_p2 = scmp.lt.u32.totalorder %s274_s26, %s384_s3 }
  0x88   :  { %p280_p3 = pnand %p278_p2, %p275_p1 }
  0x8a   :  { %283 = shalt.err (!%p280_p3)
}
  0x8b   :  { %170 = dma.vmem_to_hbm [thread:$0]  %s168_s21, 16, %s384_s3, [#allocation4]  }
  0x8c   :  { %288 = dma.done.wait [#allocation4], 16  }
  0x8d   :  { %289 = vsyncadd [#allocation4], 4294967280 }
  0x8e   :  { %174 = vsyncpa [#allocation3], 1 }
  0x8f   :  { %175 = vsyncpa [#allocation6], 1 }
  0x90   :  { %176 = vsyncpa [#allocation4], 1 }

</bundles_post_ra>
